<compile_context>
chip_gen: v5e
topology: v5e:2x2
jax: 0.10.0
libtpu: 0.0.40
codegen_flags: <defaults>
</compile_context>

<pallas_src>
import jax
import jax.numpy as jnp
from jax.experimental import pallas as pl
from jax.experimental.pallas import tpu as pltpu


def _gelu(x):
    # exact (erf) GELU to match torch.nn.functional.gelu default
    return jax.nn.gelu(x, approximate=False)


def _round_up(n, m):
    return ((n + m - 1) // m) * m


# --------------------------------------------------------------------------
# Kernel 1: fused  x[nan_row]=0 ; y = x @ W + b ; y[~keep]=0
#   * (B, T, Din) collapsed to (B*T, Din), grid over M tiles.
#   * NaN row mask computed in-kernel; optional mode mask streamed only when
#     the mask mode is not 'all_true'.
# --------------------------------------------------------------------------
def _make_fc_kernel(use_mode_mask):
    def kernel(*refs):
        if use_mode_mask:
            x_ref, w_ref, b_ref, m_ref, o_ref = refs
        else:
            x_ref, w_ref, b_ref, o_ref = refs
        x = x_ref[...]                                          # (TM, Din)
        nan_any = jnp.max(jnp.where(x != x, 1.0, 0.0), axis=-1, keepdims=True)
        is_nan_row = nan_any > 0.5                              # (TM, 1)
        xz = jnp.where(is_nan_row, 0.0, x)                      # zero NaN rows
        keep = jnp.logical_not(is_nan_row)
        if use_mode_mask:
            keep = jnp.logical_and(keep, m_ref[...] > 0.5)
        y = jnp.dot(xz, w_ref[...], preferred_element_type=jnp.float32) + b_ref[...]
        o_ref[...] = jnp.where(keep, y, 0.0)
    return kernel


def input_fc_with_mask(x, w, b, mode_mask=None):
    B, T, Din = x.shape
    H = w.shape[1]
    BT = B * T
    TM = min(512, BT)                 # HBM-bound: big M tiles (~85% of roofline)
    n_blk = pl.cdiv(BT, TM)
    BT_pad = n_blk * TM
    x2 = x.reshape(BT, Din)
    if BT_pad != BT:
        x2 = jnp.pad(x2, ((0, BT_pad - BT), (0, 0)))

    in_specs = [
        pl.BlockSpec((TM, Din), lambda i: (i, 0)),
        pl.BlockSpec((Din, H), lambda i: (0, 0)),
        pl.BlockSpec((1, H), lambda i: (0, 0)),
    ]
    args = [x2, w, b.reshape(1, H)]
    use_mm = mode_mask is not None
    if use_mm:
        m2 = mode_mask.astype(jnp.float32).reshape(BT, 1)
        if BT_pad != BT:
            m2 = jnp.pad(m2, ((0, BT_pad - BT), (0, 0)))
        in_specs.append(pl.BlockSpec((TM, 1), lambda i: (i, 0)))
        args.append(m2)

    y = pl.pallas_call(
        _make_fc_kernel(use_mm),
        out_shape=jax.ShapeDtypeStruct((BT_pad, H), jnp.float32),
        grid=(n_blk,),
        in_specs=in_specs,
        out_specs=pl.BlockSpec((TM, H), lambda i: (i, 0)),
        compiler_params=pltpu.CompilerParams(
            dimension_semantics=("parallel",), vmem_limit_bytes=32 << 20),
    )(*args)
    return y[:BT].reshape(B, T, H)


# --------------------------------------------------------------------------
# Kernel 2: one fused ConvBlock per pallas_call.
#   residual = x (or 1x1-proj(x)); t1 = conv1(gelu(x)); out = conv2(gelu(t1))
#   + residual.  Zero padding and the t1 intermediate live in VMEM scratch.
#   For the LAST block the tfd causal-conv trend heads (+ their mean) are
#   fused into the epilogue while the output is still resident in VMEM.
# --------------------------------------------------------------------------
def _make_conv_block_kernel(K, d, T, has_proj, trend_kernels):
    pad = ((K - 1) * d) // 2           # same-pad (kernel_size=3 -> pad = d)
    off = _round_up(pad, 8)            # 8-aligned start for the big T-row store
    hi = (K - 1) * d - pad             # zero-halo rows above the data
    n_heads = len(trend_kernels)
    kmax = max(trend_kernels) if n_heads else 1
    off_t = _round_up(kmax - 1, 8)
    inv_n = (1.0 / float(n_heads)) if n_heads else 0.0

    def kernel(*refs):
        i = 0
        x_ref = refs[i]; i += 1
        if has_proj:
            wp_ref, bp_ref = refs[i], refs[i + 1]; i += 2
        w1_ref, b1_ref, w2_ref, b2_ref = refs[i:i + 4]; i += 4
        wt_refs = refs[i:i + n_heads]; i += n_heads
        bt_refs = refs[i:i + n_heads]; i += n_heads
        o_ref = refs[i]; i += 1
        if n_heads:
            to_ref = refs[i]; i += 1
        pad1, pad2 = refs[i], refs[i + 1]; i += 2
        if n_heads:
            tbuf = refs[i]

        x = x_ref[0]                                            # (T, Cin)
        if has_proj:
            residual = (jnp.dot(x, wp_ref[...], preferred_element_type=jnp.float32)
                        + bp_ref[...])
        else:
            residual = x
        Cout = o_ref.shape[-1]

        # Zero only the halo rows.  Scratch persists across grid steps, but
        # the batch axis is 'parallel' (a core may not see program_id==0), so
        # we re-zero the few halo rows every step -- still removes the full
        # (T+2d, C) store per buffer per step that the old code did.
        def zero_halo(buf, lo_rows, hi_start, hi_rows):
            c = buf.shape[-1]
            if lo_rows > 0:
                buf[pl.ds(0, lo_rows), :] = jnp.zeros((lo_rows, c), jnp.float32)
            if hi_rows > 0:
                buf[pl.ds(hi_start, hi_rows), :] = jnp.zeros((hi_rows, c),
                                                             jnp.float32)

        # conv1: same-pad dilated conv on gelu(x); padding built in VMEM.
        zero_halo(pad1, off, off + T, hi)
        pad1[pl.ds(off, T), :] = _gelu(x)      # 8-aligned unmasked store
        acc = jnp.zeros((T, Cout), jnp.float32)
        for j in range(K):                     # unrolled taps (static offsets)
            acc = acc + jnp.dot(pad1[pl.ds(off - pad + j * d, T), :], w1_ref[j],
                                preferred_element_type=jnp.float32)
        t1 = acc + b1_ref[...]

        # conv2 on gelu(t1); residual add fused into the epilogue.
        zero_halo(pad2, off, off + T, hi)
        pad2[pl.ds(off, T), :] = _gelu(t1)
        acc2 = jnp.zeros((T, Cout), jnp.float32)
        for j in range(K):
            acc2 = acc2 + jnp.dot(pad2[pl.ds(off - pad + j * d, T), :], w2_ref[j],
                                  preferred_element_type=jnp.float32)
        out = acc2 + b2_ref[...] + residual
        o_ref[0] = out

        # fused tfd trend heads (last block only): h never leaves VMEM here.
        if n_heads:
            comp = to_ref.shape[-1]
            zero_halo(tbuf, off_t, off_t + T, 0)
            tbuf[pl.ds(off_t, T), :] = out
            acc_t = jnp.zeros((T, comp), jnp.float32)
            for hidx, k in enumerate(trend_kernels):
                head = jnp.zeros((T, comp), jnp.float32)
                for j in range(k):
                    # causal conv: out[t] = b + sum_j h[t - (k-1) + j] @ W[j]
                    head = head + jnp.dot(tbuf[pl.ds(off_t - (k - 1) + j, T), :],
                                          wt_refs[hidx][j],
                                          preferred_element_type=jnp.float32)
                acc_t = acc_t + head + bt_refs[hidx][...]
            to_ref[0] = acc_t * inv_n
    return kernel


def conv_block(h, blk, trend_params=None, trend_kernels=()):
    """One fused ConvBlock.  If trend_params is given, the tfd causal-conv
    heads and their mean are computed in the same kernel (epilogue fusion) and
    (h, trend) is returned; otherwise just h."""
    B, T, Cin = h.shape
    K, _, Cout = blk["w1"].shape
    d = blk["dilation"]
    has_proj = "proj_w" in blk
    trend_kernels = tuple(trend_kernels) if trend_params else ()
    n_heads = len(trend_kernels)
    comp = trend_params[0]["w"].shape[2] if n_heads else 0

    pad = ((K - 1) * d) // 2
    off = _round_up(pad, 8)
    hi = (K - 1) * d - pad
    buflen = off + T + hi
    kmax = max(trend_kernels) if n_heads else 1
    off_t = _round_up(kmax - 1, 8)

    in_specs = [pl.BlockSpec((1, T, Cin), lambda i: (i, 0, 0))]
    args = [h]
    if has_proj:
        in_specs += [pl.BlockSpec((Cin, Cout), lambda i: (0, 0)),
                     pl.BlockSpec((1, Cout), lambda i: (0, 0))]
        args += [blk["proj_w"][0], blk["proj_b"].reshape(1, Cout)]
    in_specs += [pl.BlockSpec((K, Cin, Cout), lambda i: (0, 0, 0)),
                 pl.BlockSpec((1, Cout), lambda i: (0, 0)),
                 pl.BlockSpec((K, Cout, Cout), lambda i: (0, 0, 0)),
                 pl.BlockSpec((1, Cout), lambda i: (0, 0))]
    args += [blk["w1"], blk["b1"].reshape(1, Cout),
             blk["w2"], blk["b2"].reshape(1, Cout)]
    for k, p in zip(trend_kernels, trend_params or []):
        in_specs.append(pl.BlockSpec((k, Cout, comp), lambda i: (0, 0, 0)))
        args.append(p["w"])
    for p in (trend_params or []):
        in_specs.append(pl.BlockSpec((1, comp), lambda i: (0, 0)))
        args.append(p["b"].reshape(1, comp))

    out_shape = [jax.ShapeDtypeStruct((B, T, Cout), jnp.float32)]
    out_specs = [pl.BlockSpec((1, T, Cout), lambda i: (i, 0, 0))]
    if n_heads:
        out_shape.append(jax.ShapeDtypeStruct((B, T, comp), jnp.float32))
        out_specs.append(pl.BlockSpec((1, T, comp), lambda i: (i, 0, 0)))

    scratch = [pltpu.VMEM((buflen, Cin), jnp.float32),
               pltpu.VMEM((buflen, Cout), jnp.float32)]
    if n_heads:
        scratch.append(pltpu.VMEM((off_t + T, Cout), jnp.float32))

    # TODO(synk): for production sequence lengths, additionally tile T with a
    # halo of (K-1)*d rows per block (kmax-1 for the trend buffer) so the
    # per-step working set fits v7x's 64 MiB VMEM and its two TensorCores get
    # enough grid steps when B is small.
    return pl.pallas_call(
        _make_conv_block_kernel(K, d, T, has_proj, trend_kernels),
        out_shape=tuple(out_shape) if n_heads else out_shape[0],
        grid=(B,),
        in_specs=in_specs,
        out_specs=tuple(out_specs) if n_heads else out_specs[0],
        scratch_shapes=scratch,
        compiler_params=pltpu.CompilerParams(
            dimension_semantics=("parallel",), vmem_limit_bytes=32 << 20),
    )(*args)


# --------------------------------------------------------------------------
# Kernel 3: BandedFourierLayer per-frequency complex matmul, blocked over
# frequencies.  wr/wi are streamed raw (once each); the complex product is
# four real batched matmuls; zr and zi are two lane-dense outputs.
# --------------------------------------------------------------------------
def _fourier_kernel(xr_ref, xi_ref, wr_ref, wi_ref, br_ref, bi_ref,
                    zr_ref, zi_ref):
    dn = (((2,), (1,)), ((0,), (0,)))                 # 'fbi,fio->fbo'
    xr, xi = xr_ref[...], xi_ref[...]
    wr, wi = wr_ref[...], wi_ref[...]
    rr = jax.lax.dot_general(xr, wr, dn, preferred_element_type=jnp.float32)
    ii = jax.lax.dot_general(xi, wi, dn, preferred_element_type=jnp.float32)
    ri = jax.lax.dot_general(xr, wi, dn, preferred_element_type=jnp.float32)
    ir = jax.lax.dot_general(xi, wr, dn, preferred_element_type=jnp.float32)
    zr_ref[...] = rr - ii + br_ref[...]
    zi_ref[...] = ri + ir + bi_ref[...]


def banded_fourier_layer(x, wr, wi, br, bi):
    """Full-band (num_bands=1, band=0) BandedFourierLayer. x: (B, T, Cin)."""
    B, T, Cin = x.shape
    F_ = T // 2 + 1
    Cout = wr.shape[2]
    assert wr.shape[0] == F_, "layer `length` must equal the sequence length"

    # TODO(synk): rfft/irfft have no Pallas primitive; they stay in plain JAX.
    xf = jnp.fft.rfft(x.astype(jnp.float32), axis=1)                    # (B,F,Cin)
    xr = jnp.transpose(jnp.real(xf), (1, 0, 2)).astype(jnp.float32)     # (F,B,Cin)
    xi = jnp.transpose(jnp.imag(xf), (1, 0, 2)).astype(jnp.float32)
    br3 = br.reshape(F_, 1, Cout)
    bi3 = bi.reshape(F_, 1, Cout)

    # Frequencies per grid step, derived from a double-buffered VMEM streaming
    # budget (weights dominate: 2 * Cin * Cout f32 per frequency).  Fits the
    # 32 MiB scoped limit on v6e/v7x with headroom; the ragged last F block is
    # handled by Pallas boundary masking (no padding copies of the weights).
    per_freq_bytes = 4 * (2 * B * Cin + 2 * Cin * Cout + 2 * Cout + 2 * B * Cout)
    budget_bytes = 24 << 20
    Fb = int(max(1, min(F_, budget_bytes // (2 * per_freq_bytes))))
    n_blk = pl.cdiv(F_, Fb)

    zr, zi = pl.pallas_call(
        _fourier_kernel,
        out_shape=(jax.ShapeDtypeStruct((F_, B, Cout), jnp.float32),
                   jax.ShapeDtypeStruct((F_, B, Cout), jnp.float32)),
        grid=(n_blk,),
        in_specs=[
            pl.BlockSpec((Fb, B, Cin), lambda f: (f, 0, 0)),
            pl.BlockSpec((Fb, B, Cin), lambda f: (f, 0, 0)),
            pl.BlockSpec((Fb, Cin, Cout), lambda f: (f, 0, 0)),
            pl.BlockSpec((Fb, Cin, Cout), lambda f: (f, 0, 0)),
            pl.BlockSpec((Fb, 1, Cout), lambda f: (f, 0, 0)),
            pl.BlockSpec((Fb, 1, Cout), lambda f: (f, 0, 0)),
        ],
        out_specs=(pl.BlockSpec((Fb, B, Cout), lambda f: (f, 0, 0)),
                   pl.BlockSpec((Fb, B, Cout), lambda f: (f, 0, 0))),
        compiler_params=pltpu.CompilerParams(
            dimension_semantics=("parallel",), vmem_limit_bytes=32 << 20),
    )(xr, xi, wr, wi, br3, bi3)

    zf = jnp.transpose(zr + 1j * zi, (1, 0, 2))                  # (B,F,Cout)
    # band==0, num_bands==1 => output_fft[:, 0:F] = zf (full spectrum).
    return jnp.fft.irfft(zf, n=T, axis=1)


# --------------------------------------------------------------------------
# Parameters (deterministic synthetic init; shapes follow the PyTorch module)
# --------------------------------------------------------------------------
def init_params(key, input_dims, output_dims, kernels, length, hidden_dims, depth):
    comp = output_dims // 2
    keys = iter(jax.random.split(key, 256))

    def nrm(shape, scale=0.1):
        return scale * jax.random.normal(next(keys), shape, dtype=jnp.float32)

    params = {
        "fc_w": nrm((input_dims, hidden_dims)),
        "fc_b": nrm((hidden_dims,)),
    }
    channels = [hidden_dims] * depth + [output_dims]
    blocks = []
    in_ch = hidden_dims
    for i, out_ch in enumerate(channels):
        final = (i == len(channels) - 1)
        blk = {
            "dilation": 2 ** i,
            "w1": nrm((3, in_ch, out_ch)), "b1": nrm((out_ch,)),
            "w2": nrm((3, out_ch, out_ch)), "b2": nrm((out_ch,)),
        }
        if in_ch != out_ch or final:
            blk["proj_w"] = nrm((1, in_ch, out_ch))
            blk["proj_b"] = nrm((out_ch,))
        blocks.append(blk)
        in_ch = out_ch
    params["blocks"] = blocks
    params["tfd"] = [{"w": nrm((k, output_dims, comp)), "b": nrm((comp,))}
                     for k in kernels]
    F_ = length // 2 + 1
    params["sfd"] = {"wr": nrm((F_, output_dims, comp)),
                     "wi": nrm((F_, output_dims, comp)),
                     "br": nrm((F_, comp)),
                     "bi": nrm((F_, comp))}
    return params


# --------------------------------------------------------------------------
# Forward pass (eval-mode semantics; mask='all_true' default like the module)
# --------------------------------------------------------------------------
def cost_encoder_forward(params, x, kernels, mask="all_true", tcn_output=False):
    B, T, _ = x.shape
    if mask == "all_true":
        mode_mask = None                    # keep = ~nan_row, computed in-kernel
    elif mask == "all_false":
        mode_mask = jnp.zeros((B, T), jnp.float32)
    elif mask == "mask_last":
        mode_mask = jnp.ones((B, T), jnp.float32).at[:, -1].set(0.0)
    else:
        # TODO(synk): 'binomial'/'continuous' masks use host-side numpy RNG.
        raise NotImplementedError(mask)

    # x[nan_rows]=0 ; x = input_fc(x) ; x[~(mask & nan_mask)]=0   (one kernel)
    h = input_fc_with_mask(x, params["fc_w"], params["fc_b"], mode_mask)

    # DilatedConvEncoder: one fused pallas_call per ConvBlock
    blocks = params["blocks"]
    for blk in blocks[:-1]:
        h = conv_block(h, blk)

    if tcn_output:
        return conv_block(h, blocks[-1])

    # Last ConvBlock with the tfd trend heads fused into its epilogue.
    h, trend = conv_block(h, blocks[-1], trend_params=params["tfd"],
                          trend_kernels=kernels)

    # season head: BandedFourierLayer (single band -> full spectrum)
    sf = params["sfd"]
    season = banded_fourier_layer(h, sf["wr"], sf["wi"], sf["br"], sf["bi"])
    # repr_dropout(p=0.1): identity in eval mode.
    # TODO(synk): training-mode dropout (stateful RNG) not applied.
    return trend, season


if __name__ == "__main__":
    B, T = 2, 16
    input_dims, output_dims, hidden_dims, depth = 4, 16, 32, 2
    kernels = [1, 2, 4]

    key = jax.random.PRNGKey(0)
    kx, kp = jax.random.split(key)
    x = jax.random.normal(kx, (B, T, input_dims), dtype=jnp.float32)
    x = x.at[0, 3, 1].set(jnp.nan)   # exercise the NaN-row masking path

    params = init_params(kp, input_dims, output_dims, kernels,
                         length=T, hidden_dims=hidden_dims, depth=depth)

    trend, season = cost_encoder_forward(params, x, kernels)
    jax.block_until_ready((trend, season))

    assert trend.shape == (B, T, output_dims // 2)
    assert season.shape == (B, T, output_dims // 2)
    assert bool(jnp.isfinite(trend).all()) and bool(jnp.isfinite(season).all())
    print("KERNEL_OK")
</pallas_src>

<mosaic_0001>
module attributes {stable_mosaic.version = 11 : i64} {
  func.func @kernel(%arg0: i32, %arg1: memref<32x4xf32, #tpu.memory_space<vmem>>, %arg2: memref<4x32xf32, #tpu.memory_space<vmem>>, %arg3: memref<1x32xf32, #tpu.memory_space<vmem>>, %arg4: memref<32x32xf32, #tpu.memory_space<vmem>>) attributes {dimension_semantics = [#tpu.dimension_semantics<parallel>], iteration_bounds = array<i64: 1>, scalar_prefetch = 0 : i64, scratch_operands = 0 : i64, tpu.core_type = #tpu.core_type<tc>, window_params = [{transform_indices = @transform_0, window_bounds = array<i64: 32, 4>}, {pipeline_mode = #tpu.pipeline_mode<synchronous>, transform_indices = @transform_1, window_bounds = array<i64: 4, 32>}, {pipeline_mode = #tpu.pipeline_mode<synchronous>, transform_indices = @transform_2, window_bounds = array<i64: 1, 32>}, {transform_indices = @transform_3, window_bounds = array<i64: 32, 32>}]} {
    %c0 = arith.constant 0 : index
    %c0_0 = arith.constant 0 : index
    %0 = vector.load %arg1[%c0, %c0_0] : memref<32x4xf32, #tpu.memory_space<vmem>>, vector<32x4xf32>
    %1 = arith.cmpf one, %0, %0 : vector<32x4xf32>
    %cst = arith.constant 1.000000e+00 : f32
    %cst_1 = arith.constant 0.000000e+00 : f32
    %2 = vector.broadcast %cst : f32 to vector<32x4xf32>
    %3 = vector.broadcast %cst_1 : f32 to vector<32x4xf32>
    %4 = arith.select %1, %2, %3 : vector<32x4xi1>, vector<32x4xf32>
    %cst_2 = arith.constant dense<0xFF800000> : vector<32xf32>
    %5 = vector.multi_reduction <maximumf>, %4, %cst_2 [1] : vector<32x4xf32> to vector<32xf32>
    %6 = vector.shape_cast %5 : vector<32xf32> to vector<32x1xf32>
    %cst_3 = arith.constant 5.000000e-01 : f32
    %7 = vector.broadcast %cst_3 : f32 to vector<32x1xf32>
    %8 = arith.cmpf ogt, %6, %7 : vector<32x1xf32>
    %cst_4 = arith.constant 0.000000e+00 : f32
    %9 = vector.shape_cast %8 : vector<32x1xi1> to vector<32x1xi1>
    %10 = vector.broadcast %9 : vector<32x1xi1> to vector<32x4xi1>
    %11 = vector.broadcast %cst_4 : f32 to vector<32x4xf32>
    %12 = arith.select %10, %11, %0 : vector<32x4xi1>, vector<32x4xf32>
    %cst_5 = arith.constant dense<true> : vector<32x1xi1>
    %13 = arith.xori %8, %cst_5 : vector<32x1xi1>
    %c0_6 = arith.constant 0 : index
    %c0_7 = arith.constant 0 : index
    %14 = vector.load %arg2[%c0_6, %c0_7] : memref<4x32xf32, #tpu.memory_space<vmem>>, vector<4x32xf32>
    %cst_8 = arith.constant dense<0.000000e+00> : vector<32x32xf32>
    %15 = tpu.matmul %12, %14, %cst_8 {dimension_numbers = #tpu.dot_dimension_numbers<[1], [0], [0], [1], [0, 0, 1, 1], [], []>} : vector<32x4xf32>, vector<4x32xf32>, vector<32x32xf32> -> vector<32x32xf32>
    %c0_9 = arith.constant 0 : index
    %c0_10 = arith.constant 0 : index
    %16 = vector.load %arg3[%c0_9, %c0_10] : memref<1x32xf32, #tpu.memory_space<vmem>>, vector<1x32xf32>
    %17 = vector.broadcast %16 : vector<1x32xf32> to vector<32x32xf32>
    %18 = arith.addf %15, %17 : vector<32x32xf32>
    %cst_11 = arith.constant 0.000000e+00 : f32
    %19 = vector.shape_cast %13 : vector<32x1xi1> to vector<32x1xi1>
    %20 = vector.broadcast %19 : vector<32x1xi1> to vector<32x32xi1>
    %21 = vector.broadcast %cst_11 : f32 to vector<32x32xf32>
    %22 = arith.select %20, %18, %21 : vector<32x32xi1>, vector<32x32xf32>
    %c0_12 = arith.constant 0 : index
    %c0_13 = arith.constant 0 : index
    %23 = vector.load %arg4[%c0_12, %c0_13] : memref<32x32xf32, #tpu.memory_space<vmem>>, vector<32x32xf32>
    tpu.vector_store %arg4[%c0_12, %c0_13], %22 {strides = array<i32>} : memref<32x32xf32, #tpu.memory_space<vmem>>, vector<32x32xf32>,
    return
  }
  func.func @transform_0(%arg0: i32) -> (i32, i32) {
    %c0_i32 = arith.constant 0 : i32
    %c0_i32_0 = arith.constant 0 : i32
    return %arg0, %c0_i32 : i32, i32
  }
  func.func @transform_1(%arg0: i32) -> (i32, i32) {
    %c0_i32 = arith.constant 0 : i32
    %c0_i32_0 = arith.constant 0 : i32
    %c0_i32_1 = arith.constant 0 : i32
    return %c0_i32, %c0_i32_0 : i32, i32
  }
  func.func @transform_2(%arg0: i32) -> (i32, i32) {
    %c0_i32 = arith.constant 0 : i32
    %c0_i32_0 = arith.constant 0 : i32
    %c0_i32_1 = arith.constant 0 : i32
    return %c0_i32, %c0_i32_0 : i32, i32
  }
  func.func @transform_3(%arg0: i32) -> (i32, i32) {
    %c0_i32 = arith.constant 0 : i32
    %c0_i32_0 = arith.constant 0 : i32
    return %arg0, %c0_i32 : i32, i32
  }
}

</mosaic_0001>

<bundles_post_ra>
// kernel: tpu_custom_call.1
= control target key start
LH: loop header
LB: loop body
LE: loop exit
PB: predicated region body
PF: predicated region fallthrough
CT: control target
= control target key end

     0   :  { %vm27_vm0 = vcmask 31744   ;;  %s255_s0 = inlined_call_operand.vmem [shape: f32[32,4], index: 0, kind: input, shape index: {}]   ;;  %s256_s1 = inlined_call_operand.vmem [shape: f32[4,32], index: 1, kind: input, shape index: {}]   ;;  %s257_s2 = inlined_call_operand.vmem [shape: f32[1,32], index: 2, kind: input, shape index: {}]   ;;  %s258_s3 = inlined_call_operand.hbm [shape: f32[32,32], index: 3, kind: output, shape index: {}]  }
   0x1   :  { %v17_v0 = vld [vmem:[%s255_s0 + $0x10] sm:$0xff]  ;;  %v15_v1 = vld [vmem:[%s255_s0] sm:$0xff]  ;;  %v18_v2 = vld [vmem:[%s255_s0 + $0x18] sm:$0xff] }
   0x2   :  { %vm21_vm1 = vcmp.ne.f32.partialorder %v17_v0, %v17_v0  ;;  %vm19_vm2 = vcmp.ne.f32.partialorder %v15_v1, %v15_v1  ;;  %v16_v3 = vld [vmem:[%s255_s0 + $0x8] sm:$0xff] }
   0x3   :  { %8 = vsyncpa [#allocation3], 0  ;;  %v185_v4 = vmov 0.0   ;;  %vm22_vm3 = vcmp.ne.f32.partialorder %v18_v2, %v18_v2  ;;  %vm20_vm4 = vcmp.ne.f32.partialorder %v16_v3, %v16_v3  ;;  %v60_v13 = vld [vmem:[%s256_s1] sm:$0xf]  ;;  %vm77_vm5 = vcmask 1043456  }
   0x4   :  { %v25_v5 = vsel %vm21_vm1, 1.0, %v185_v4  ;;  %v23_v6 = vsel %vm19_vm2, 1.0, %v185_v4  ;;  %v26_v9 = vsel %vm22_vm3, 1.0, %v185_v4  ;;  %v24_v10 = vsel %vm20_vm4, 1.0, %v185_v4  ;;  %145 = vmatpush.msk.msra.mxu0 %vm77_vm5, %v60_v13  ;;  %151 = vmatpush.msk.msra.mxu2 %vm77_vm5, %v60_v13  ;;  %v158_v22 = vld [vmem:[%s257_s2] ss:$0 sm:$0xff] }
   0x5   :  { %v34_v7 = vsel %vm27_vm0, %v25_v5, -inf  ;;  %v28_v8 = vsel %vm27_vm0, %v23_v6, -inf  ;;  %v37_v11 = vsel %vm27_vm0, %v26_v9, -inf  ;;  %v31_v12 = vsel %vm27_vm0, %v24_v10, -inf  ;;  %150 = vmatpush.msk.msra.mxu1 %vm77_vm5, %v60_v13  ;;  %152 = vmatpush.msk.msra.mxu3 %vm77_vm5, %v60_v13  ;;  %s187_s2 = smov [#allocation2]   ;;  %s133_s25 = sshll.u32 %s258_s3, 4  ;;  %s134_s25 = int_to_ptr.hbm [resolvable:$true] %s133_s25 }
   0x6   :  { %35 = vmax.xlane.f32.xlu0 %v34_v7  ;;  %29 = vmax.xlane.f32.xlu1 %v28_v8  ;;  %vm122_vm10 = vcmask 261120   ;;  %vm186_vm11 = vmmov 1   ;;  %s131_s22 = sshll.u32 %s187_s2, 4  ;;  %s188_s26 = smov 128   ;;  %s132_s22 = int_to_ptr.vmem [resolvable:$true] %s131_s22 }
   0x7   :  { %s189_s27 = smov 8  }
   0xe   :  { %38 = vmax.xlane.f32.xlu0 %v37_v11  ;;  %32 = vmax.xlane.f32.xlu1 %v31_v12 }
  0x79   :  { %v36_v14 = vpop.xlane.xlu0 %35  ;;  %v30_v15 = vpop.xlane.xlu1 %29 }
  0x7a   :  { %vm42_vm6 = vcmp.gt.f32.partialorder %v36_v14, 0.5  ;;  %vm40_vm7 = vcmp.gt.f32.partialorder %v30_v15, 0.5 }
  0x7b   :  { %v54_v16 = vsel %vm42_vm6, 0.0, %v17_v0  ;;  %v52_v17 = vsel %vm40_vm7, 0.0, %v15_v1  ;;  %vm56_vm12 = vmxor %vm40_vm7, %vm186_vm11 }
  0x7c   :  { %146 = vmatmul.msk.f32.vlgmr.msra.gmra.mxu0 %vm27_vm0, %v52_v17  ;;  %148 = vmatmul.msk.f32.vlgmr.msra.gmra.mxu2 %vm27_vm0, %v54_v16  ;;  %vm58_vm13 = vmxor %vm42_vm6, %vm186_vm11 }
  0x81   :  { %v39_v18 = vpop.xlane.xlu0 %38  ;;  %v33_v19 = vpop.xlane.xlu1 %32 }
  0x82   :  { %vm43_vm8 = vcmp.gt.f32.partialorder %v39_v18, 0.5  ;;  %vm41_vm9 = vcmp.gt.f32.partialorder %v33_v19, 0.5 }
  0x83   :  { %v55_v20 = vsel %vm43_vm8, 0.0, %v18_v2  ;;  %v53_v21 = vsel %vm41_vm9, 0.0, %v16_v3  ;;  %vm57_vm14 = vmxor %vm41_vm9, %vm186_vm11 }
  0x84   :  { %147 = vmatmul.msk.f32.vlgmr.msra.gmra.mxu1 %vm27_vm0, %v53_v21  ;;  %149 = vmatmul.msk.f32.vlgmr.msra.gmra.mxu3 %vm27_vm0, %v55_v20  ;;  %vm59_vm15 = vmxor %vm43_vm8, %vm186_vm11 }
  0xf9   :  { %v98_v23 = vpop.f32.mrf.mxu0 }
  0xfa   :  { %v99_v24 = vadd.f32 %v158_v22, %v98_v23 }
  0xfc   :  { %v118_v25 = vsel %vm56_vm12, %v99_v24, 0.0 }
  0xfd   :  { %123 = vst.msk [vmem:[#allocation2] sm:$0xff] %vm122_vm10, %v118_v25 }
  0xff   :  { %v104_v26 = vpop.f32.mrf.mxu2 }
 0x100   :  { %v105_v27 = vadd.f32 %v158_v22, %v104_v26 }
 0x101   :  { %v101_v28 = vpop.f32.mrf.mxu1 }
 0x102   :  { %v120_v29 = vsel %vm58_vm13, %v105_v27, 0.0  ;;  %v102_v30 = vadd.f32 %v158_v22, %v101_v28 }
 0x103   :  { %125 = vst.msk [vmem:[#allocation2 + $0x10] sm:$0xff] %vm122_vm10, %v120_v29 }
 0x104   :  { %v119_v31 = vsel %vm57_vm14, %v102_v30, 0.0 }
 0x105   :  { %124 = vst.msk [vmem:[#allocation2 + $0x8] sm:$0xff] %vm122_vm10, %v119_v31 }
 0x107   :  { %v107_v32 = vpop.f32.mrf.mxu3 }
 0x108   :  { %v108_v33 = vadd.f32 %v158_v22, %v107_v32 }
 0x10a   :  { %v121_v34 = vsel %vm59_vm15, %v108_v33, 0.0 }
 0x10b   :  { %126 = vst.msk [vmem:[#allocation2 + $0x18] sm:$0xff] %vm122_vm10, %v121_v34 }
 0x10c   :  { %139 = dma.vmem_to_hbm [thread:$0]  %s132_s22, 512, %s134_s25, [#allocation3], %s188_s26, %s188_s26, %s189_s27  }
 0x10d   :  { %183 = dma.done.wait [#allocation3], 512  }
 0x10e   :  { %184 = vsyncadd [#allocation3], 4294966784 }
 0x10f   :  { %144 = vsyncpa [#allocation3], 1 }

</bundles_post_ra>
